<compile_context>
chip_gen: v7x
topology: tpu7x:2x2x1
jax: 0.10.0
libtpu: 0.0.40
codegen_flags: <defaults>
</compile_context>

<pallas_src>
import functools

import jax
import jax.numpy as jnp
import numpy as np
from jax.experimental import pallas as pl
from jax.experimental.pallas import tpu as pltpu


def _round_up(x, m):
    return (x + m - 1) // m * m


def _offsets(batch, c, cr):
    """Row offsets of the blocks inside the single packed parameter operand."""
    r_wgk = 0                                        # block-diag [Wg ; Wk]
    r_w1 = _round_up(r_wgk + 2 * batch * cr, 8)      # block-diag fc1
    r_w2 = _round_up(r_w1 + batch * cr, 8)           # block-diag fc2
    r_sel = _round_up(r_w2 + batch * c, 8)           # per-batch channel selector
    rows = _round_up(r_sel + batch, 8)
    cols = batch * c
    return r_wgk, r_w1, r_w2, r_sel, rows, cols


def pack_params(wg, wk, w1, w2, batch):
    """One-time, HOST-side packing of all parameters into one VMEM operand.

    Done outside the hot path (numpy), so the per-call wrapper issues no
    concatenate/stack ops and the kernel needs a single weight DMA.
    """
    wg = np.asarray(wg, np.float32)
    wk = np.asarray(wk, np.float32)
    w1 = np.asarray(w1, np.float32)
    w2 = np.asarray(w2, np.float32)
    cr, c = wg.shape
    r_wgk, r_w1, r_w2, r_sel, rows, cols = _offsets(batch, c, cr)
    p = np.zeros((rows, cols), np.float32)
    for b in range(batch):
        # block-diagonal Wg / Wk: every image's 1x1 convs in ONE MXU pass
        p[r_wgk + b * cr: r_wgk + (b + 1) * cr, b * c:(b + 1) * c] = wg
        p[r_wgk + batch * cr + b * cr: r_wgk + batch * cr + (b + 1) * cr,
          b * c:(b + 1) * c] = wk
        # block-diagonal fc1 / fc2: whole-batch MLP is exactly two matmuls
        p[r_w1 + b * cr: r_w1 + (b + 1) * cr, b * cr:(b + 1) * cr] = w1
        p[r_w2 + b * c: r_w2 + (b + 1) * c, b * cr:(b + 1) * cr] = w2
        # selector row b: ones over that image's channel rows of (B*C, HW) x
        p[r_sel + b, b * c:(b + 1) * c] = 1.0
    return jnp.asarray(p)


def make_border_mask(h, w, border):
    """Host-precomputed 0/1 border mask, matching the PyTorch slice-zeroing
    (including the degenerate border==0 and 2*border>=H/W cases)."""
    m = np.ones((h, w), np.float32)
    if border <= 0:
        m[:] = 0.0          # torch's "-0:" slice zeroes the whole map
    else:
        m[:border, :] = 0.0
        m[max(h - border, 0):, :] = 0.0
        m[:, :border] = 0.0
        m[:, max(w - border, 0):] = 0.0
    return jnp.asarray(m.reshape(1, h * w))


def _make_kernel(batch, c, cr, hw, leaky_slope=0.01, round_activation=True):
    r_wgk, r_w1, r_w2, r_sel, _, _ = _offsets(batch, c, cr)
    bcr = batch * cr
    bc = batch * c

    def kernel(x_ref, p_ref, mask_ref, o_ref):
        x = x_ref[...]                                    # (B*C, HW)  f32
        wgk = p_ref[r_wgk:r_wgk + 2 * bcr, :]             # (2*B*Cr, B*C)
        w1 = p_ref[r_w1:r_w1 + bcr, 0:bcr]                # (B*Cr, B*Cr)
        w2 = p_ref[r_w2:r_w2 + bc, 0:bcr]                 # (B*C, B*Cr)
        sel = p_ref[r_sel:r_sel + batch, :]               # (B, B*C)
        mask = mask_ref[...]                              # (1, HW)

        # (1) Wg & Wk for every batch image in a single MXU pass.
        f = jnp.dot(wgk, x, preferred_element_type=jnp.float32)   # (2BCr, HW)
        fg = f[:bcr, :]
        fk = f[bcr:, :]

        # (2) Row-wise softmax pieces; normalisation folded into the scalar.
        fk_max = jnp.max(fk, axis=-1, keepdims=True)               # (BCr, 1)
        ex = jnp.exp(fk - fk_max)                                  # (BCr, HW)

        # (3) Softmax numerators & denominators for all images with ONE MXU
        #     contraction (sublane concat is layout-free; no XLU lane sums).
        ones_col = jnp.ones((hw, 1), dtype=jnp.float32)
        numden = jnp.dot(jnp.concatenate([fg * ex, ex], axis=0), ones_col,
                         preferred_element_type=jnp.float32)       # (2BCr, 1)
        # exact reciprocal + f32 matmuls on purpose: keeps round() gate stable
        nl = numden[:bcr, :] * pl.reciprocal(numden[bcr:, :])      # (BCr, 1)

        # (4) Batched fc1 -> LeakyReLU -> fc2 -> sigmoid -> round
        #     (block-diagonal weights: two dots total, not 2*B).
        y1 = jnp.dot(w1, nl, preferred_element_type=jnp.float32)   # (BCr, 1)
        y1 = jnp.where(y1 >= 0, y1, leaky_slope * y1)
        y2 = jnp.dot(w2, y1, preferred_element_type=jnp.float32)   # (BC, 1)
        y2 = jax.nn.sigmoid(y2)
        if round_activation:
            y2 = jnp.round(y2)                 # half-to-even == torch.round

        # (5) Channel-gated spatial map for all images: one broadcast multiply
        #     and one (B, B*C) @ (B*C, HW) MXU dot; then a single lane-dense
        #     store of the whole (B, HW) result.
        scene = jnp.dot(sel, y2 * x, preferred_element_type=jnp.float32)  # (B,HW)
        o_ref[...] = jax.nn.sigmoid(scene) * mask

    return kernel


@functools.partial(jax.jit, static_argnames=("reduction", "round_activation"))
def class_related_attention(x_nchw, packed_params, border_mask, *, reduction,
                            round_activation=True):
    """x_nchw: (B,C,H,W). packed_params from pack_params(). mask from make_border_mask()."""
    b, c, h, w = x_nchw.shape
    cr = c // reduction
    hw = h * w

    # (B,C,H,W) -> (B*C, HW): contiguous reshape only (no transpose, no extra
    # HBM read/write of x before the kernel).
    x2d = x_nchw.reshape(b * c, hw).astype(jnp.float32)

    kernel = _make_kernel(b, c, cr, hw, round_activation=round_activation)
    out = pl.pallas_call(
        kernel,
        out_shape=jax.ShapeDtypeStruct((b, hw), jnp.float32),
        grid_spec=pltpu.PrefetchScalarGridSpec(
            num_scalar_prefetch=0,
            grid=(1,),                          # whole (tiny) problem, one step
            in_specs=[
                pl.BlockSpec((b * c, hw), lambda i: (0, 0)),          # x
                pl.BlockSpec(tuple(packed_params.shape), lambda i: (0, 0)),
                pl.BlockSpec((1, hw), lambda i: (0, 0)),              # mask
            ],
            out_specs=pl.BlockSpec((b, hw), lambda i: (0, 0)),
        ),
        compiler_params=pltpu.CompilerParams(
            dimension_semantics=("arbitrary",)),
    )(x2d, packed_params, border_mask)
    return out.reshape(b, 1, h, w)


def reference(x, wg, wk, w1, w2, *, reduction, border=4, round_activation=True):
    """Pure-JAX reference mirroring the PyTorch forward."""
    b, c, h, w = x.shape
    xf = x.reshape(b, c, -1).astype(jnp.float32)
    fg = jnp.einsum('mc,bcp->bmp', wg, xf, precision='highest')
    fk = jnp.einsum('mc,bcp->bmp', wk, xf, precision='highest')
    fk = jax.nn.softmax(fk, axis=-1)
    nl = jnp.sum(fg * fk, axis=-1)                                # (b, cr)
    y1 = jnp.einsum('ij,bj->bi', w1, nl, precision='highest')
    y1 = jnp.where(y1 >= 0, y1, 0.01 * y1)
    y2 = jnp.einsum('cj,bj->bc', w2, y1, precision='highest')
    y2 = jax.nn.sigmoid(y2)
    if round_activation:
        y2 = jnp.round(y2)
    scene = jnp.sum(xf * y2[:, :, None], axis=1, keepdims=True)   # (b,1,hw)
    attn = jax.nn.sigmoid(scene).reshape(b, 1, h, w)
    attn = attn.at[..., :border, :].set(0.0)
    attn = attn.at[..., -border:, :].set(0.0)
    attn = attn.at[..., :, :border].set(0.0)
    attn = attn.at[..., :, -border:].set(0.0)
    return attn


if __name__ == "__main__":
    B, C, H, W = 2, 32, 16, 16
    REDUCTION = 4
    BORDER = 4
    CR = C // REDUCTION

    key = jax.random.PRNGKey(0)
    k_x, k_wg, k_wk, k_w1, k_w2 = jax.random.split(key, 5)

    x = jax.random.normal(k_x, (B, C, H, W), dtype=jnp.float32)
    # Deterministic normal init (emulating net_init_weights_normal).
    wg = 0.1 * jax.random.normal(k_wg, (CR, C), dtype=jnp.float32)
    wk = 0.1 * jax.random.normal(k_wk, (CR, C), dtype=jnp.float32)
    w1 = 0.1 * jax.random.normal(k_w1, (CR, CR), dtype=jnp.float32)
    w2 = 0.1 * jax.random.normal(k_w2, (C, CR), dtype=jnp.float32)

    packed = pack_params(wg, wk, w1, w2, batch=B)     # one-time, host-side
    mask = make_border_mask(H, W, BORDER)             # one-time, host-side

    out = class_related_attention(x, packed, mask, reduction=REDUCTION,
                                  round_activation=True)
    out = jax.block_until_ready(out)

    ref = jax.block_until_ready(
        reference(x, wg, wk, w1, w2, reduction=REDUCTION, border=BORDER,
                  round_activation=True))

    assert out.shape == (B, 1, H, W)
    assert np.all(np.isfinite(np.asarray(out)))
    np.testing.assert_allclose(np.asarray(out), np.asarray(ref),
                               atol=1e-4, rtol=1e-4)
    print("KERNEL_OK")
</pallas_src>

<mosaic_0001>
module attributes {stable_mosaic.version = 11 : i64} {
  func.func @kernel(%arg0: i32, %arg1: memref<64x256xf32, #tpu.memory_space<vmem>>, %arg2: memref<120x64xf32, #tpu.memory_space<vmem>>, %arg3: memref<1x256xf32, #tpu.memory_space<vmem>>, %arg4: memref<2x256xf32, #tpu.memory_space<vmem>>) attributes {dimension_semantics = [#tpu.dimension_semantics<arbitrary>], iteration_bounds = array<i64: 1>, scalar_prefetch = 0 : i64, scratch_operands = 0 : i64, tpu.core_type = #tpu.core_type<tc>, window_params = [{pipeline_mode = #tpu.pipeline_mode<synchronous>, transform_indices = @transform_0, window_bounds = array<i64: 64, 256>}, {pipeline_mode = #tpu.pipeline_mode<synchronous>, transform_indices = @transform_1, window_bounds = array<i64: 120, 64>}, {pipeline_mode = #tpu.pipeline_mode<synchronous>, transform_indices = @transform_2, window_bounds = array<i64: 1, 256>}, {pipeline_mode = #tpu.pipeline_mode<synchronous>, transform_indices = @transform_3, window_bounds = array<i64: 2, 256>}]} {
    %c0 = arith.constant 0 : index
    %c0_0 = arith.constant 0 : index
    %0 = vector.load %arg1[%c0, %c0_0] : memref<64x256xf32, #tpu.memory_space<vmem>>, vector<64x256xf32>
    %c0_1 = arith.constant 0 : index
    %c0_2 = arith.constant 0 : index
    %1 = vector.load %arg2[%c0_1, %c0_2] : memref<120x64xf32, #tpu.memory_space<vmem>>, vector<32x64xf32>
    %c32 = arith.constant 32 : index
    %c0_3 = arith.constant 0 : index
    %2 = vector.load %arg2[%c32, %c0_3] : memref<120x64xf32, #tpu.memory_space<vmem>>, vector<16x16xf32>
    %c48 = arith.constant 48 : index
    %c0_4 = arith.constant 0 : index
    %3 = vector.load %arg2[%c48, %c0_4] : memref<120x64xf32, #tpu.memory_space<vmem>>, vector<64x16xf32>
    %c112 = arith.constant 112 : index
    %c0_5 = arith.constant 0 : index
    %4 = vector.load %arg2[%c112, %c0_5] : memref<120x64xf32, #tpu.memory_space<vmem>>, vector<2x64xf32>
    %c0_6 = arith.constant 0 : index
    %c0_7 = arith.constant 0 : index
    %5 = vector.load %arg3[%c0_6, %c0_7] : memref<1x256xf32, #tpu.memory_space<vmem>>, vector<1x256xf32>
    %cst = arith.constant dense<0.000000e+00> : vector<32x256xf32>
    %6 = tpu.matmul %1, %0, %cst {dimension_numbers = #tpu.dot_dimension_numbers<[1], [0], [0], [1], [0, 0, 1, 1], [], []>} : vector<32x64xf32>, vector<64x256xf32>, vector<32x256xf32> -> vector<32x256xf32>
    %7 = vector.extract_strided_slice %6 {offsets = [0, 0], sizes = [16, 256], strides = [1, 1]} : vector<32x256xf32> to vector<16x256xf32>
    %8 = vector.extract_strided_slice %6 {offsets = [16, 0], sizes = [16, 256], strides = [1, 1]} : vector<32x256xf32> to vector<16x256xf32>
    %cst_8 = arith.constant dense<0xFF800000> : vector<16xf32>
    %9 = vector.multi_reduction <maximumf>, %8, %cst_8 [1] : vector<16x256xf32> to vector<16xf32>
    %10 = vector.shape_cast %9 : vector<16xf32> to vector<16x1xf32>
    %11 = vector.broadcast %10 : vector<16x1xf32> to vector<16x256xf32>
    %12 = arith.subf %8, %11 : vector<16x256xf32>
    %13 = math.exp %12 : vector<16x256xf32>
    %cst_9 = arith.constant 1.000000e+00 : f32
    %14 = vector.broadcast %cst_9 : f32 to vector<256x1xf32>
    %15 = arith.mulf %7, %13 : vector<16x256xf32>
    %16 = tpu.concatenate %15, %13 in 0 : vector<16x256xf32>, vector<16x256xf32> -> vector<32x256xf32>
    %cst_10 = arith.constant dense<0.000000e+00> : vector<32x1xf32>
    %17 = tpu.matmul %16, %14, %cst_10 {dimension_numbers = #tpu.dot_dimension_numbers<[1], [0], [0], [1], [0, 0, 1, 1], [], []>} : vector<32x256xf32>, vector<256x1xf32>, vector<32x1xf32> -> vector<32x1xf32>
    %18 = vector.extract_strided_slice %17 {offsets = [0, 0], sizes = [16, 1], strides = [1, 1]} : vector<32x1xf32> to vector<16x1xf32>
    %19 = vector.extract_strided_slice %17 {offsets = [16, 0], sizes = [16, 1], strides = [1, 1]} : vector<32x1xf32> to vector<16x1xf32>
    %20 = tpu.reciprocal %19 : vector<16x1xf32> -> vector<16x1xf32>
    %21 = arith.mulf %18, %20 : vector<16x1xf32>
    %cst_11 = arith.constant dense<0.000000e+00> : vector<16x1xf32>
    %22 = tpu.matmul %2, %21, %cst_11 {dimension_numbers = #tpu.dot_dimension_numbers<[1], [0], [0], [1], [0, 0, 1, 1], [], []>} : vector<16x16xf32>, vector<16x1xf32>, vector<16x1xf32> -> vector<16x1xf32>
    %cst_12 = arith.constant 0.000000e+00 : f32
    %23 = vector.broadcast %cst_12 : f32 to vector<16x1xf32>
    %24 = arith.cmpf oge, %22, %23 : vector<16x1xf32>
    %cst_13 = arith.constant 0.00999999977 : f32
    %25 = vector.broadcast %cst_13 : f32 to vector<16x1xf32>
    %26 = arith.mulf %25, %22 : vector<16x1xf32>
    %27 = arith.select %24, %22, %26 : vector<16x1xi1>, vector<16x1xf32>
    %cst_14 = arith.constant dense<0.000000e+00> : vector<64x1xf32>
    %28 = tpu.matmul %3, %27, %cst_14 {dimension_numbers = #tpu.dot_dimension_numbers<[1], [0], [0], [1], [0, 0, 1, 1], [], []>} : vector<64x16xf32>, vector<16x1xf32>, vector<64x1xf32> -> vector<64x1xf32>
    %29 = arith.negf %28 : vector<64x1xf32>
    %30 = math.exp %29 : vector<64x1xf32>
    %cst_15 = arith.constant 1.000000e+00 : f32
    %31 = vector.broadcast %cst_15 : f32 to vector<64x1xf32>
    %32 = arith.addf %31, %30 : vector<64x1xf32>
    %33 = arith.divf %31, %32 : vector<64x1xf32>
    %34 = math.roundeven %33 : vector<64x1xf32>
    %35 = vector.broadcast %34 : vector<64x1xf32> to vector<64x256xf32>
    %36 = arith.mulf %35, %0 : vector<64x256xf32>
    %cst_16 = arith.constant dense<0.000000e+00> : vector<2x256xf32>
    %37 = tpu.matmul %4, %36, %cst_16 {dimension_numbers = #tpu.dot_dimension_numbers<[1], [0], [0], [1], [0, 0, 1, 1], [], []>} : vector<2x64xf32>, vector<64x256xf32>, vector<2x256xf32> -> vector<2x256xf32>
    %38 = arith.negf %37 : vector<2x256xf32>
    %39 = math.exp %38 : vector<2x256xf32>
    %cst_17 = arith.constant 1.000000e+00 : f32
    %40 = vector.broadcast %cst_17 : f32 to vector<2x256xf32>
    %41 = arith.addf %40, %39 : vector<2x256xf32>
    %42 = arith.divf %40, %41 : vector<2x256xf32>
    %43 = vector.broadcast %5 : vector<1x256xf32> to vector<2x256xf32>
    %44 = arith.mulf %42, %43 : vector<2x256xf32>
    %c0_18 = arith.constant 0 : index
    %c0_19 = arith.constant 0 : index
    %45 = vector.load %arg4[%c0_18, %c0_19] : memref<2x256xf32, #tpu.memory_space<vmem>>, vector<2x256xf32>
    tpu.vector_store %arg4[%c0_18, %c0_19], %44 {strides = array<i32>} : memref<2x256xf32, #tpu.memory_space<vmem>>, vector<2x256xf32>,
    return
  }
  func.func @transform_0(%arg0: i32) -> (i32, i32) {
    %c0_i32 = arith.constant 0 : i32
    %c0_i32_0 = arith.constant 0 : i32
    %c0_i32_1 = arith.constant 0 : i32
    return %c0_i32, %c0_i32_0 : i32, i32
  }
  func.func @transform_1(%arg0: i32) -> (i32, i32) {
    %c0_i32 = arith.constant 0 : i32
    %c0_i32_0 = arith.constant 0 : i32
    %c0_i32_1 = arith.constant 0 : i32
    return %c0_i32, %c0_i32_0 : i32, i32
  }
  func.func @transform_2(%arg0: i32) -> (i32, i32) {
    %c0_i32 = arith.constant 0 : i32
    %c0_i32_0 = arith.constant 0 : i32
    %c0_i32_1 = arith.constant 0 : i32
    return %c0_i32, %c0_i32_0 : i32, i32
  }
  func.func @transform_3(%arg0: i32) -> (i32, i32) {
    %c0_i32 = arith.constant 0 : i32
    %c0_i32_0 = arith.constant 0 : i32
    %c0_i32_1 = arith.constant 0 : i32
    return %c0_i32, %c0_i32_0 : i32, i32
  }
}

</mosaic_0001>

<bundles_post_ra>
// kernel: class_related_attention.1
= control target key start
LH: loop header
LB: loop body
LE: loop exit
PB: predicated region body
PF: predicated region fallthrough
CT: control target
= control target key end

     0   :  { %v931_v3 = vmov 0.0   ;;  %vm46_vm0 = vcmask 523264   ;;  %v932_v29 = vmov 1.0|1.0   ;;  %vm259_vm1 = vcmask 130048   ;;  %s1137_s0 = inlined_call_operand.vmem [shape: f32[64,256], index: 0, kind: input, shape index: {}]   ;;  %s1138_s1 = inlined_call_operand.vmem [shape: f32[120,64], index: 1, kind: input, shape index: {}]   ;;  %s1139_s2 = inlined_call_operand.vmem [shape: f32[1,256], index: 2, kind: input, shape index: {}]   ;;  %s1140_s3 = inlined_call_operand.vmem [shape: f32[2,256], index: 3, kind: output, shape index: {}]  }
   0x1   :  { %v957_v0 = vld [vmem:[%s1137_s0 + $0x8] sm:$0xff]  ;;  %v962_v1 = vld [vmem:[%s1137_s0 + $0x18] sm:$0xff]  ;;  %v967_v2 = vld [vmem:[%s1137_s0] sm:$0xff]  ;;  %123 = vmatprep.mubr.f32.mxu0 %v931_v3  ;;  %826 = vmatprep.subr.bf16.mxu1 %v932_v29 }
   0x2   :  { %v810_v4 = vpack.c.bf16 %v962_v1, %v957_v0  ;;  %v975_v5 = vld [vmem:[%s1137_s0 + $0x10] sm:$0xff]  ;;  %v980_v6 = vld [vmem:[%s1137_s0 + $0x28] sm:$0xff]  ;;  %v985_v7 = vld [vmem:[%s1137_s0 + $0x38] sm:$0xff]  ;;  %827 = vmatpush3.bf16.msra.mxu1 %v932_v29 }
   0x3   :  { %v812_v8 = vpack.c.bf16 %v975_v5, %v967_v2  ;;  %v814_v9 = vpack.c.bf16 %v985_v7, %v980_v6  ;;  %v994_v10 = vld [vmem:[%s1137_s0 + $0x20] sm:$0xff]  ;;  %v999_v11 = vld [vmem:[%s1137_s0 + $0x30] sm:$0xff]  ;;  %v1004_v12 = vld [vmem:[%s1137_s0 + $0x48] sm:$0xff]  ;;  %828 = vmatprep.subr.bf16.mxu1 %v932_v29 }
   0x4   :  { %811 = vmatprep.subr.bf16.mxu0 %v810_v4  ;;  %v1009_v13 = vld [vmem:[%s1137_s0 + $0x58] sm:$0xff]  ;;  %v816_v14 = vpack.c.bf16 %v999_v11, %v994_v10  ;;  %v1018_v16 = vld [vmem:[%s1137_s0 + $0x40] sm:$0xff]  ;;  %v1023_v17 = vld [vmem:[%s1137_s0 + $0x50] sm:$0xff] }
   0x5   :  { %813 = vmatpush1.bf16.msra.mxu0 %v812_v8  ;;  %v818_v15 = vpack.c.bf16 %v1009_v13, %v1004_v12  ;;  %v1028_v18 = vld [vmem:[%s1137_s0 + $0x68] sm:$0xff]  ;;  %v1033_v19 = vld [vmem:[%s1137_s0 + $0x78] sm:$0xff]  ;;  %v820_v20 = vpack.c.bf16 %v1023_v17, %v1018_v16  ;;  %v1042_v22 = vld [vmem:[%s1137_s0 + $0x60] sm:$0xff] }
   0x6   :  { %815 = vmatprep.subr.bf16.mxu0 %v814_v9  ;;  %v822_v21 = vpack.c.bf16 %v1033_v19, %v1028_v18  ;;  %v1047_v23 = vld [vmem:[%s1137_s0 + $0x70] sm:$0xff]  ;;  %v30_v25 = vld [vmem:[%s1138_s1] sm:$0xff]  ;;  %v31_v26 = vld [vmem:[%s1138_s1 + $0x8] sm:$0xff]  ;;  %829 = vmatpush3.bf16.msra.mxu1 %v932_v29 }
   0x7   :  { %v824_v24 = vpack.c.bf16 %v1047_v23, %v1042_v22  ;;  %v32_v27 = vld [vmem:[%s1138_s1 + $0x10] sm:$0xff]  ;;  %v33_v28 = vld [vmem:[%s1138_s1 + $0x18] sm:$0xff]  ;;  %830 = vmatprep.subr.bf16.mxu1 %v932_v29  ;;  %v34_v58 = vld [vmem:[%s1138_s1 + $0x20] sm:$0xff] }
   0x9   :  { %817 = vmatpush1.bf16.msra.mxu0 %v816_v14 }
   0xa   :  { %819 = vmatprep.subr.bf16.mxu0 %v818_v15  ;;  %831 = vmatpush3.bf16.msra.mxu1 %v932_v29 }
   0xb   :  { %832 = vmatprep.subr.bf16.mxu1 %v932_v29 }
   0xd   :  { %821 = vmatpush1.bf16.msra.mxu0 %v820_v20 }
   0xe   :  { %823 = vmatprep.subr.bf16.mxu0 %v822_v21  ;;  %833 = vmatpush3.bf16.msra.mxu1 %v932_v29 }
   0xf   :  { %834 = vmatprep.subr.bf16.mxu1 %v932_v29 }
  0x11   :  { %825 = vmatpush1.bf16.msra.mxu0 %v824_v24 }
  0x12   :  { %835 = vmatpush3.bf16.msra.mxu1 %v932_v29 }
  0x13   :  { %836 = vmatprep.subr.bf16.mxu1 %v932_v29 }
  0x14   :  { %703 = vmatmul.mubr.msk.f32.vlgmr.msra.gmra.mrb[0].mxu0 %vm46_vm0, %v30_v25 }
  0x15   :  { %129 = vmatprep.mubr.f32.mxu0 %v931_v3 }
  0x16   :  { %837 = vmatpush3.bf16.msra.mxu1 %v932_v29 }
  0x17   :  { %838 = vmatprep.subr.bf16.mxu1 %v932_v29 }
  0x18   :  { %704 = vmatmul.mubr.msk.f32.gmra.mrb[2].mxu0 %vm46_vm0, %v31_v26 }
  0x19   :  { %135 = vmatprep.mubr.f32.mxu0 %v931_v3 }
  0x1a   :  { %839 = vmatpush3.bf16.msra.mxu1 %v932_v29 }
  0x1b   :  { %840 = vmatprep.subr.bf16.mxu1 %v932_v29 }
  0x1c   :  { %705 = vmatmul.mubr.msk.f32.gmra.mrb[4].mxu0 %vm46_vm0, %v32_v27 }
  0x1d   :  { %141 = vmatprep.mubr.f32.mxu0 %v931_v3 }
  0x1e   :  { %841 = vmatpush3.bf16.msra.mxu1 %v932_v29  ;;  %v36_v29 = vld [vmem:[%s1138_s1 + $0x30] sm:$0xff] }
  0x20   :  { %706 = vmatmul.mubr.msk.f32.gmra.mrb[6].mxu0 %vm46_vm0, %v33_v28  ;;  %v35_v28 = vld [vmem:[%s1138_s1 + $0x28] sm:$0xff] }
  0x21   :  { %791 = vmatprep.mubr.msk.f32.mxu0 %vm259_vm1, %v34_v58 }
  0xe7   :  { %v125_v30 = vpop.f32.mrb[0].mxu0 }
  0xe8   :  { %v127_v31 = vpop.f32.mrb[1].mxu0 }
  0xeb   :  { %v131_v32 = vpop.f32.mrb[2].mxu0 }
  0xec   :  { %v133_v33 = vpop.f32.mrb[3].mxu0 }
  0xef   :  { %v137_v34 = vpop.f32.mrb[4].mxu0 }
  0xf0   :  { %v139_v35 = vpop.f32.mrb[5].mxu0 }
  0xf1   :  { %v148_v36 = vmax.f32 %v137_v34, %v139_v35 }
  0xf3   :  { %149 = vmax.xlane.f32.xlu0 %v148_v36  ;;  %v143_v37 = vpop.f32.mrb[6].mxu0 }
  0xf4   :  { %v145_v38 = vpop.f32.mrb[7].mxu0 }
  0xf5   :  { %v151_v39 = vmax.f32 %v143_v37, %v145_v38 }
  0xf7   :  { %152 = vmax.xlane.f32.xlu0 %v151_v39  ;;  %v39_v39 = vld [vmem:[%s1138_s1 + $0x48] sm:$0xff] }
 0x180   :  { %v150_v40 = vpop.xlane.xlu0 %149 }
 0x181   :  { %v154_v41 = vsub.f32 %v137_v34, %v150_v40  ;;  %v155_v42 = vsub.f32 %v139_v35, %v150_v40  ;;  %v40_v40 = vld [vmem:[%s1138_s1 + $0x50] sm:$0xff] }
 0x183   :  { %v158_v43 = vmul.f32 1.442695, %v154_v41  ;;  %v160_v44 = vmul.f32 1.442695, %v155_v42  ;;  %v41_v41 = vld [vmem:[%s1138_s1 + $0x58] sm:$0xff]  ;;  %v42_v42 = vld [vmem:[%s1138_s1 + $0x60] sm:$0xff] }
 0x184   :  { %v153_v45 = vpop.xlane.xlu0 %152 }
 0x185   :  { %879 = vpow2.f32 %v158_v43  ;;  %v156_v46 = vsub.f32 %v143_v37, %v153_v45  ;;  %v157_v47 = vsub.f32 %v145_v38, %v153_v45  ;;  %v37_v37 = vld [vmem:[%s1138_s1 + $0x38] sm:$0xff]  ;;  %v38_v38 = vld [vmem:[%s1138_s1 + $0x40] sm:$0xff]  ;;  %v43_v43 = vld [vmem:[%s1138_s1 + $0x68] sm:$0xff] }
 0x186   :  { %881 = vpow2.f32 %v160_v44  ;;  %v933_v44 = vmov 0  }
 0x187   :  { %v162_v48 = vmul.f32 1.442695, %v156_v46  ;;  %v164_v49 = vmul.f32 1.442695, %v157_v47  ;;  %877 = vset.pattern.permute.xlu1 %v933_v44  ;;  %878 = vset.pattern.permute.xlu0 %v933_v44 }
 0x189   :  { %883 = vpow2.f32 %v162_v48 }
 0x18a   :  { %885 = vpow2.f32 %v164_v49 }
 0x18f   :  { %v880_v50 = vpop.eup %879 }
 0x190   :  { %v882_v51 = vpop.eup %881  ;;  %v166_v52 = vmul.f32 %v880_v50, %v125_v30 }
 0x191   :  { %v167_v53 = vmul.f32 %v882_v51, %v127_v31 }
 0x193   :  { %v884_v54 = vpop.eup %883  ;;  %234 = vmatprep.mubr.f32.mxu1 %v167_v53 }
 0x194   :  { %v886_v55 = vpop.eup %885  ;;  %235 = vmatmul.mubr.f32.vlgmr.msra.gmra.mrb[0].mxu1 %v166_v52  ;;  %v168_v56 = vmul.f32 %v884_v54, %v131_v32 }
 0x195   :  { %v169_v57 = vmul.f32 %v886_v55, %v133_v33 }
 0x197   :  { %239 = vmatprep.mubr.f32.mxu1 %v169_v57 }
 0x198   :  { %240 = vmatmul.mubr.f32.gmra.mrb[2].mxu1 %v168_v56 }
 0x199   :  { %244 = vmatprep.mubr.f32.mxu1 %v882_v51 }
 0x19c   :  { %245 = vmatmul.mubr.f32.gmra.mrb[4].mxu1 %v880_v50 }
 0x19d   :  { %249 = vmatprep.mubr.f32.mxu1 %v886_v55 }
 0x1a0   :  { %250 = vmatmul.mubr.f32.gmra.mrb[6].mxu1 %v884_v54 }
 0x1a1   :  { %655 = vmatprep.mubr.f32.mxu1 %v931_v3 }
 0x267   :  { %v761_v59 = vpop.f32.mrb[0].mxu1 }
 0x268   :  { %v762_v60 = vpop.f32.mrb[1].mxu1 }
 0x269   :  { %v763_v61 = vadd.f32 %v762_v60, %v761_v59 }
 0x26b   :  { %v764_v62 = vpop.f32.mrb[2].mxu1 }
 0x26c   :  { %v765_v63 = vpop.f32.mrb[3].mxu1 }
 0x26d   :  { %v766_v4 = vadd.f32 %v765_v63, %v764_v62 }
 0x26f   :  { %v767_v8 = vpop.f32.mrb[4].mxu1 }
 0x270   :  { %v768_v9 = vpop.f32.mrb[5].mxu1 }
 0x271   :  { %v769_v14 = vadd.f32 %v768_v9, %v767_v8 }
 0x273   :  { %887 = vrcp.f32 %v769_v14  ;;  %v770_v15 = vpop.f32.mrb[6].mxu1 }
 0x274   :  { %v771_v20 = vpop.f32.mrb[7].mxu1 }
 0x275   :  { %v772_v3 = vadd.f32 %v771_v20, %v770_v15 }
 0x277   :  { %889 = vrcp.f32 %v772_v3 }
 0x27d   :  { %v888_v21 = vpop.eup %887 }
 0x27e   :  { %v257_v24 = vmul.f32 %v888_v21, %v763_v61 }
 0x281   :  { %v890_v25 = vpop.eup %889 }
 0x282   :  { %v258_v26 = vmul.f32 %v890_v25, %v766_v4 }
 0x284   :  { %v842_v27 = vpack.c.bf16 %v258_v26, %v257_v24 }
 0x286   :  { %843 = vmatprep.subr.bf16.mxu0 %v842_v27 }
 0x287   :  { %845 = vmatpush3.bf16.msra.mxu0 %v842_v27 }
 0x28a   :  { %792 = vmatmul.mubr.msk.f32.vlgmr.msra.gmra.mrb[8].mxu0 %vm259_vm1, %v35_v28 }
 0x28b   :  { %798 = vmatprep.mubr.msk.f32.mxu0 %vm259_vm1, %v36_v29 }
 0x35d   :  { %v793_v30 = vpop.f32.mrb[8].mxu0 }
 0x35e   :  { %vm342_vm2 = vcmp.ge.f32.partialorder %v793_v30, 0.0  ;;  %v344_v31 = vmul.f32 0.01, %v793_v30  ;;  %v332_v32 = vpop.f32.mrb[9].mxu0 }
 0x35f   :  { %vm341_vm3 = vcmp.ge.f32.partialorder %v332_v32, 0.0  ;;  %v343_v33 = vmul.f32 0.01, %v332_v32 }
 0x360   :  { %v346_v34 = vsel %vm342_vm2, %v793_v30, %v344_v31 }
 0x361   :  { %v345_v35 = vsel %vm341_vm3, %v332_v32, %v343_v33 }
 0x362   :  { %v846_v36 = vpack.c.bf16 %v346_v34, %v345_v35 }
 0x364   :  { %847 = vmatprep.subr.bf16.mxu0 %v846_v36 }
 0x365   :  { %849 = vmatpush3.bf16.msra.mxu0 %v846_v36 }
 0x368   :  { %799 = vmatmul.mubr.msk.f32.vlgmr.msra.gmra.mrb[10].mxu0 %vm259_vm1, %v37_v37 }
 0x369   :  { %801 = vmatprep.mubr.msk.f32.mxu0 %vm259_vm1, %v38_v38 }
 0x36c   :  { %802 = vmatmul.mubr.msk.f32.gmra.mrb[12].mxu0 %vm259_vm1, %v39_v39 }
 0x36d   :  { %804 = vmatprep.mubr.msk.f32.mxu0 %vm259_vm1, %v40_v40 }
 0x370   :  { %805 = vmatmul.mubr.msk.f32.gmra.mrb[14].mxu0 %vm259_vm1, %v41_v41 }
 0x371   :  { %807 = vmatprep.mubr.msk.f32.mxu0 %vm259_vm1, %v42_v42 }
 0x374   :  { %808 = vmatmul.mubr.msk.f32.gmra.mrb[16].mxu0 %vm259_vm1, %v43_v43 }
 0x43b   :  { %v800_v45 = vpop.f32.mrb[10].mxu0 }
 0x43c   :  { %v718_v46 = vmul.f32 -1.442695, %v800_v45  ;;  %v437_v47 = vpop.f32.mrb[11].mxu0 }
 0x43d   :  { %v717_v48 = vmul.f32 -1.442695, %v437_v47 }
 0x43e   :  { %891 = vpow2.f32 %v718_v46 }
 0x43f   :  { %893 = vpow2.f32 %v717_v48  ;;  %v803_v49 = vpop.f32.mrb[12].mxu0 }
 0x440   :  { %v720_v50 = vmul.f32 -1.442695, %v803_v49  ;;  %v447_v51 = vpop.f32.mrb[13].mxu0 }
 0x441   :  { %v719_v52 = vmul.f32 -1.442695, %v447_v51 }
 0x442   :  { %895 = vpow2.f32 %v720_v50 }
 0x443   :  { %897 = vpow2.f32 %v719_v52  ;;  %v806_v53 = vpop.f32.mrb[14].mxu0 }
 0x444   :  { %v722_v54 = vmul.f32 -1.442695, %v806_v53  ;;  %v457_v55 = vpop.f32.mrb[15].mxu0 }
 0x445   :  { %v721_v56 = vmul.f32 -1.442695, %v457_v55 }
 0x446   :  { %899 = vpow2.f32 %v722_v54 }
 0x447   :  { %v809_v57 = vpop.f32.mrb[16].mxu0  ;;  %901 = vpow2.f32 %v721_v56 }
 0x448   :  { %v892_v58 = vpop.eup %891  ;;  %v467_v59 = vpop.f32.mrb[17].mxu0  ;;  %v724_v15 = vmul.f32 -1.442695, %v809_v57 }
 0x449   :  { %v894_v60 = vpop.eup %893  ;;  %v501_v61 = vadd.f32 1.0, %v892_v58  ;;  %v723_v62 = vmul.f32 -1.442695, %v467_v59 }
 0x44a   :  { %v500_v63 = vadd.f32 1.0, %v894_v60 }
 0x44b   :  { %903 = vpow2.f32 %v723_v62 }
 0x44c   :  { %v896_v4 = vpop.eup %895  ;;  %905 = vrcp.f32 %v501_v61 }
 0x44d   :  { %v898_v8 = vpop.eup %897  ;;  %v503_v9 = vadd.f32 1.0, %v896_v4  ;;  %907 = vrcp.f32 %v500_v63 }
 0x44e   :  { %v502_v14 = vadd.f32 1.0, %v898_v8 }
 0x450   :  { %v900_v20 = vpop.eup %899  ;;  %909 = vrcp.f32 %v502_v14 }
 0x451   :  { %911 = vrcp.f32 %v503_v9  ;;  %v505_v3 = vadd.f32 1.0, %v900_v20  ;;  %v902_v21 = vpop.eup %901 }
 0x452   :  { %913 = vpow2.f32 %v724_v15  ;;  %v504_v26 = vadd.f32 1.0, %v902_v21 }
 0x453   :  { %915 = vrcp.f32 %v505_v3 }
 0x454   :  { %917 = vrcp.f32 %v504_v26 }
 0x455   :  { %v904_v24 = vpop.eup %903 }
 0x456   :  { %v906_v25 = vpop.eup %905  ;;  %v506_v29 = vadd.f32 1.0, %v904_v24 }
 0x457   :  { %v867_v27 = vround.rtne.f32 %v906_v25  ;;  %v908_v28 = vpop.eup %907  ;;  %v45_v25 = vld [vmem:[%s1139_s2] sm:$0x3] }
 0x458   :  { %v866_v34 = vround.rtne.f32 %v908_v28  ;;  %919 = vrcp.f32 %v506_v29 }
 0x459   :  { %539 = vperm.xlu1 %877, %v867_v27  }
 0x45a   :  { %v910_v30 = vpop.eup %909 }
 0x45b   :  { %v912_v31 = vpop.eup %911  ;;  %v868_v32 = vround.rtne.f32 %v910_v30 }
 0x45c   :  { %v914_v33 = vpop.eup %913  ;;  %v869_v35 = vround.rtne.f32 %v912_v31 }
 0x45d   :  { %544 = vperm.xlu0 %878, %v868_v32   ;;  %534 = vperm.xlu1 %877, %v866_v34   ;;  %v916_v36 = vpop.eup %915  ;;  %v507_v37 = vadd.f32 1.0, %v914_v33 }
 0x45e   :  { %v871_v38 = vround.rtne.f32 %v916_v36  ;;  %v918_v39 = vpop.eup %917 }
 0x45f   :  { %921 = vrcp.f32 %v507_v37  ;;  %v870_v41 = vround.rtne.f32 %v918_v39 }
 0x461   :  { %549 = vperm.xlu1 %877, %v869_v35  }
 0x462   :  { %v920_v40 = vpop.eup %919 }
 0x463   :  { %v872_v42 = vround.rtne.f32 %v920_v40 }
 0x465   :  { %559 = vperm.xlu1 %877, %v871_v38  }
 0x469   :  { %554 = vperm.xlu1 %877, %v870_v41   ;;  %v922_v43 = vpop.eup %921 }
 0x46a   :  { %v873_v44 = vround.rtne.f32 %v922_v43 }
 0x46d   :  { %564 = vperm.xlu1 %877, %v872_v42  }
 0x471   :  { %569 = vperm.xlu1 %877, %v873_v44  }
 0x4d8   :  { %v540_v45 = vpop.permute.xlu1 %539 }
 0x4d9   :  { %v574_v48 = vmul.f32 %v540_v45, %v975_v5  ;;  %v575_v49 = vmul.f32 %v540_v45, %v962_v1 }
 0x4dc   :  { %v535_v46 = vpop.permute.xlu1 %534  ;;  %v545_v47 = vpop.permute.xlu0 %544 }
 0x4dd   :  { %v572_v50 = vmul.f32 %v535_v46, %v967_v2  ;;  %v573_v51 = vmul.f32 %v535_v46, %v957_v0  ;;  %v576_v54 = vmul.f32 %v545_v47, %v994_v10  ;;  %v577_v55 = vmul.f32 %v545_v47, %v980_v6 }
 0x4df   :  { %v850_v52 = vpack.c.bf16 %v575_v49, %v573_v51  ;;  %v852_v53 = vpack.c.bf16 %v574_v48, %v572_v50 }
 0x4e0   :  { %v550_v56 = vpop.permute.xlu1 %549 }
 0x4e1   :  { %v578_v57 = vmul.f32 %v550_v56, %v999_v11  ;;  %v579_v58 = vmul.f32 %v550_v56, %v985_v7  ;;  %851 = vmatprep.subr.bf16.mxu1 %v850_v52 }
 0x4e2   :  { %853 = vmatpush1.bf16.msra.mxu1 %v852_v53 }
 0x4e3   :  { %v854_v5 = vpack.c.bf16 %v579_v58, %v577_v55  ;;  %v856_v59 = vpack.c.bf16 %v578_v57, %v576_v54 }
 0x4e4   :  { %v560_v1 = vpop.permute.xlu1 %559 }
 0x4e5   :  { %855 = vmatprep.subr.bf16.mxu1 %v854_v5  ;;  %v582_v0 = vmul.f32 %v560_v1, %v1023_v17  ;;  %v583_v60 = vmul.f32 %v560_v1, %v1009_v13 }
 0x4e6   :  { %857 = vmatpush1.bf16.msra.mxu1 %v856_v59 }
 0x4e8   :  { %v555_v2 = vpop.permute.xlu1 %554 }
 0x4e9   :  { %v580_v10 = vmul.f32 %v555_v2, %v1018_v16  ;;  %v581_v6 = vmul.f32 %v555_v2, %v1004_v12  ;;  %v44_v12 = vld [vmem:[%s1138_s1 + $0x70] sm:$0x3] }
 0x4eb   :  { %v858_v61 = vpack.c.bf16 %v583_v60, %v581_v6  ;;  %v860_v11 = vpack.c.bf16 %v582_v0, %v580_v10 }
 0x4ec   :  { %v565_v62 = vpop.permute.xlu1 %564 }
 0x4ed   :  { %859 = vmatprep.subr.bf16.mxu1 %v858_v61  ;;  %v584_v63 = vmul.f32 %v565_v62, %v1042_v22  ;;  %v585_v4 = vmul.f32 %v565_v62, %v1028_v18  ;;  %v675_v18 = vlaneseq }
 0x4ee   :  { %861 = vmatpush1.bf16.msra.mxu1 %v860_v11 }
 0x4ef   :  { %v676_v3 = vshrl.u32 %v675_v18, 7 }
 0x4f0   :  { %v570_v7 = vpop.permute.xlu1 %569 }
 0x4f1   :  { %v586_v8 = vmul.f32 %v570_v7, %v1047_v23  ;;  %v587_v17 = vmul.f32 %v570_v7, %v1033_v19  ;;  %v677_v24 = vsub.s32 0, %v676_v3  ;;  %v681_v26 = vsub.s32 1, %v676_v3 }
 0x4f3   :  { %v862_v9 = vpack.c.bf16 %v587_v17, %v585_v4  ;;  %v864_v13 = vpack.c.bf16 %v586_v8, %v584_v63  ;;  %v678_v27 = vrot.slane %v45_v25, %v677_v24  ;;  %v682_v28 = vrot.slane %v45_v25, %v681_v26 }
 0x4f5   :  { %863 = vmatprep.subr.bf16.mxu1 %v862_v9 }
 0x4f6   :  { %865 = vmatpush1.bf16.msra.mxu1 %v864_v13 }
 0x4f9   :  { %725 = vmatmul.mubr.msk.f32.vlgmr.msra.gmra.mrb[8].mxu1 %vm46_vm0, %v44_v12 }
 0x5cc   :  { %v657_v16 = vpop.f32.mrb[8].mxu1 }
 0x5cd   :  { %v726_v14 = vmul.f32 -1.442695, %v657_v16  ;;  %v659_v15 = vpop.f32.mrb[9].mxu1 }
 0x5ce   :  { %v727_v22 = vmul.f32 -1.442695, %v659_v15 }
 0x5cf   :  { %923 = vpow2.f32 %v726_v14 }
 0x5d0   :  { %925 = vpow2.f32 %v727_v22 }
 0x5d9   :  { %v924_v23 = vpop.eup %923 }
 0x5da   :  { %v926_v20 = vpop.eup %925  ;;  %v668_v19 = vadd.f32 1.0, %v924_v23 }
 0x5db   :  { %v669_v21 = vadd.f32 1.0, %v926_v20 }
 0x5dc   :  { %927 = vrcp.f32 %v668_v19 }
 0x5dd   :  { %929 = vrcp.f32 %v669_v21 }
 0x5e6   :  { %v928_v29 = vpop.eup %927 }
 0x5e7   :  { %v930_v30 = vpop.eup %929  ;;  %v685_v31 = vmul.f32 %v928_v29, %v678_v27 }
 0x5e8   :  { %v686_v32 = vmul.f32 %v930_v30, %v682_v28 }
 0x5ea   :  { %v689_v33 = vcombine.low %v685_v31, %v686_v32 }
 0x5ec   :  { %728 = vst.sshfl [vmem:[%s1140_s3] sm:$0x33 pattern:$0x76325410] %v689_v33 }

</bundles_post_ra>
